<compile_context>
chip_gen: v6e
topology: v6e:2x2x1
jax: 0.10.0
libtpu: 0.0.40
codegen_flags: <defaults>
</compile_context>

<pallas_src>
import functools
import math

import jax
import jax.numpy as jnp
from jax.experimental import pallas as pl
from jax.experimental.pallas import tpu as pltpu  # noqa: F401  (kept for CompilerParams if shapes scale up)


def _concat_conv1d_kernel(x_ref, *refs, filter_sizes, crops, c_offsets, l_pad):
    """Fused conv1d branches + center-crop + channel concat, single invocation.

    x_ref : (N, C_pad, L_in_pad)  input; channel index C_in is a constant-one
                                  channel (bias trick), remaining pad channels zero.
    refs  : (w_0, ..., w_{B-1}, o_ref)
            w_i   : (C_out_i, K_i * C_pad)  taps flattened, bias folded into the
                                            column that multiplies the ones channel.
            o_ref : (C_total, N * l_pad)    lane-dense output slab.
    """
    o_ref = refs[-1]
    w_refs = refs[:-1]
    n_batch = x_ref.shape[0]

    # Load each batch element's (C_pad, L_in_pad) slab once; reused by every branch.
    x_all = [x_ref[n].astype(jnp.float32) for n in range(n_batch)]

    for i, k_size in enumerate(filter_sizes):
        w = w_refs[i][...].astype(jnp.float32)            # (C_out_i, K_i*C_pad)
        d = crops[i]                                      # center-crop offset
        c_out = w.shape[0]
        # im2col with all batches side by side on the lane axis: (K_i*C_pad, N*l_pad).
        # Every piece is an (8k, 128)-aligned tile, so the concats are vreg stacking.
        cols = jnp.concatenate(
            [jnp.concatenate(
                [x_n[:, d + k: d + k + l_pad] for k in range(k_size)], axis=0)
             for x_n in x_all],
            axis=1)
        # One MXU matmul per branch (all K taps + bias fused), f32 accumulation.
        acc = jnp.dot(w, cols, preferred_element_type=jnp.float32)   # (C_out_i, N*l_pad)
        o_ref[c_offsets[i]: c_offsets[i] + c_out, :] = acc.astype(o_ref.dtype)


def concat_gauss_conv1d(x, weights, biases, dim=1):
    """Pallas equivalent of Concat(dim, GaussConv1d_0, GaussConv1d_1, ...).

    Each branch i is F.conv1d(x, weights[i], biases[i]) (stride 1, valid padding);
    branch outputs are center-cropped along dim 2 to the shortest one and
    concatenated along the channel axis.
    """
    # TODO(synk): only channel concat (dim=1) is fused in-kernel; other dims would
    # just be a jnp.concatenate of per-branch results (pure layout, nothing to fuse).
    assert dim == 1
    N, C_in, L = x.shape
    n_branches = len(weights)
    assert n_branches == len(biases) and n_branches >= 1

    filter_sizes = tuple(int(w.shape[2]) for w in weights)
    c_outs = tuple(int(w.shape[0]) for w in weights)
    l_outs = tuple(L - k + 1 for k in filter_sizes)
    l_target = min(l_outs)
    crops = tuple((lo - l_target) // 2 for lo in l_outs)
    c_offsets = tuple(int(sum(c_outs[:i])) for i in range(n_branches))
    c_total = int(sum(c_outs))

    # Lane-dense spatial tile: round the cropped length up to a multiple of 128 so
    # every output store fills full 128-lane vregs (no masked vst).
    l_pad = ((l_target + 127) // 128) * 128
    # Channel padding: C_in real channels + 1 ones channel (bias), rounded up to a
    # multiple of 8 sublanes so the in-kernel im2col stacking is tile aligned.
    c_pad = ((C_in + 1 + 7) // 8) * 8

    # Zero-pad x spatially so every shifted window [d+k : d+k+l_pad] is in range,
    # then append the constant-one channel plus zero pad channels.
    l_in_pad = max(crops[i] + filter_sizes[i] - 1 for i in range(n_branches)) + l_pad
    x_sp = jnp.pad(x, ((0, 0), (0, 0), (0, max(0, l_in_pad - L))))
    ones_ch = jnp.ones((N, 1, l_in_pad), x.dtype)
    zero_ch = jnp.zeros((N, c_pad - C_in - 1, l_in_pad), x.dtype)
    x_aug = jnp.concatenate([x_sp, ones_ch, zero_ch], axis=1)      # (N, c_pad, l_in_pad)

    # Flatten each branch's taps to (C_out, K*c_pad) so the K taps become a single
    # MXU matmul; fold the bias into the column that multiplies the ones channel.
    w_augs = []
    for w, b in zip(weights, biases):
        c_out, _, k = w.shape
        w_koc = jnp.transpose(w, (0, 2, 1))                        # (C_out, K, C_in)
        w_koc = jnp.pad(w_koc, ((0, 0), (0, 0), (0, c_pad - C_in)))
        w_flat = w_koc.reshape(c_out, k * c_pad)                   # [o, k*c_pad + c]
        w_flat = w_flat.at[:, C_in].set(b)       # tap 0, ones channel -> bias
        w_augs.append(w_flat.astype(x.dtype))

    kernel = functools.partial(
        _concat_conv1d_kernel,
        filter_sizes=filter_sizes, crops=crops, c_offsets=c_offsets, l_pad=l_pad)

    # Single kernel invocation (no grid): all batches + branches in one step.
    # TODO(synk): if L grows large (v7x: 64 MiB VMEM), tile the spatial axis on a
    # "parallel" grid axis with a K-1 halo and set vmem_limit_bytes; at these toy
    # shapes a single step is optimal.
    out_flat = pl.pallas_call(
        kernel,
        out_shape=jax.ShapeDtypeStruct((c_total, N * l_pad), x.dtype),
    )(x_aug, *w_augs)

    # Re-layout: (C_total, N*l_pad) -> (N, C_total, L_target).
    return out_flat.reshape(c_total, N, l_pad).transpose(1, 0, 2)[:, :, :l_target]


def _reference_concat(x, weights, biases, dim=1):
    """Pure-JAX reference with the exact Concat.forward semantics."""
    outs = []
    for w, b in zip(weights, biases):
        o = jax.lax.conv_general_dilated(
            x, w, window_strides=(1,), padding="VALID",
            dimension_numbers=("NCH", "OIH", "NCH")) + b[None, :, None]
        outs.append(o)
    l_target = min(o.shape[2] for o in outs)
    cropped = []
    for o in outs:
        d = (o.shape[2] - l_target) // 2
        cropped.append(o[:, :, d:d + l_target])
    return jnp.concatenate(cropped, axis=dim)


if __name__ == "__main__":
    # Concat(1, GaussConv1d(4->8, K=3), GaussConv1d(4->8, K=5)) over an NCL input.
    N, C_in, L = 2, 4, 16
    branch_cfg = ((8, 3), (8, 5))            # (C_out_i, filter_size_i) per submodule
    var_w, var_b = 1.0, 1.0

    key = jax.random.PRNGKey(0)
    keys = jax.random.split(key, 1 + 2 * len(branch_cfg))
    x = jax.random.normal(keys[0], (N, C_in, L), dtype=jnp.float32)

    weights, biases = [], []
    for i, (c_out, k) in enumerate(branch_cfg):
        # GaussConv1d init: weight ~ N(0, stdv^2), stdv = sqrt(2*var_w)/sqrt(C_in*K);
        # bias ~ N(0, var_b).
        stdv = math.sqrt(2.0 * var_w) / math.sqrt(C_in * k)
        weights.append(stdv * jax.random.normal(keys[1 + 2 * i], (c_out, C_in, k),
                                                dtype=jnp.float32))
        biases.append(math.sqrt(var_b) * jax.random.normal(keys[2 + 2 * i], (c_out,),
                                                           dtype=jnp.float32))

    out = concat_gauss_conv1d(x, weights, biases, dim=1)
    out = jax.block_until_ready(out)

    ref = _reference_concat(x, weights, biases, dim=1)
    l_target = L - max(k for _, k in branch_cfg) + 1
    assert out.shape == (N, sum(c for c, _ in branch_cfg), l_target), out.shape
    assert jnp.allclose(out, ref, atol=1e-5, rtol=1e-5), \
        float(jnp.max(jnp.abs(out - ref)))

    print("KERNEL_OK")
</pallas_src>

<mosaic_0001>
module attributes {stable_mosaic.version = 11 : i64} {
  func.func @_concat_conv1d_kernel(%arg0: memref<2x8x132xf32, #tpu.memory_space<vmem>>, %arg1: memref<8x24xf32, #tpu.memory_space<vmem>>, %arg2: memref<8x40xf32, #tpu.memory_space<vmem>>, %arg3: memref<16x256xf32, #tpu.memory_space<vmem>>) attributes {dimension_semantics = [], scalar_prefetch = 0 : i64, scratch_operands = 0 : i64, tpu.core_type = #tpu.core_type<tc>} {
    %c0 = arith.constant 0 : index
    %c0_0 = arith.constant 0 : index
    %c0_1 = arith.constant 0 : index
    %0 = vector.load %arg0[%c0, %c0_0, %c0_1] : memref<2x8x132xf32, #tpu.memory_space<vmem>>, vector<1x8x132xf32>
    %1 = vector.shape_cast %0 : vector<1x8x132xf32> to vector<8x132xf32>
    %c1 = arith.constant 1 : index
    %c0_2 = arith.constant 0 : index
    %c0_3 = arith.constant 0 : index
    %2 = vector.load %arg0[%c1, %c0_2, %c0_3] : memref<2x8x132xf32, #tpu.memory_space<vmem>>, vector<1x8x132xf32>
    %3 = vector.shape_cast %2 : vector<1x8x132xf32> to vector<8x132xf32>
    %c0_4 = arith.constant 0 : index
    %c0_5 = arith.constant 0 : index
    %4 = vector.load %arg1[%c0_4, %c0_5] : memref<8x24xf32, #tpu.memory_space<vmem>>, vector<8x24xf32>
    %5 = vector.extract_strided_slice %1 {offsets = [0, 1], sizes = [8, 128], strides = [1, 1]} : vector<8x132xf32> to vector<8x128xf32>
    %6 = vector.extract_strided_slice %1 {offsets = [0, 2], sizes = [8, 128], strides = [1, 1]} : vector<8x132xf32> to vector<8x128xf32>
    %7 = vector.extract_strided_slice %1 {offsets = [0, 3], sizes = [8, 128], strides = [1, 1]} : vector<8x132xf32> to vector<8x128xf32>
    %8 = tpu.concatenate %5, %6, %7 in 0 : vector<8x128xf32>, vector<8x128xf32>, vector<8x128xf32> -> vector<24x128xf32>
    %9 = vector.extract_strided_slice %3 {offsets = [0, 1], sizes = [8, 128], strides = [1, 1]} : vector<8x132xf32> to vector<8x128xf32>
    %10 = vector.extract_strided_slice %3 {offsets = [0, 2], sizes = [8, 128], strides = [1, 1]} : vector<8x132xf32> to vector<8x128xf32>
    %11 = vector.extract_strided_slice %3 {offsets = [0, 3], sizes = [8, 128], strides = [1, 1]} : vector<8x132xf32> to vector<8x128xf32>
    %12 = tpu.concatenate %9, %10, %11 in 0 : vector<8x128xf32>, vector<8x128xf32>, vector<8x128xf32> -> vector<24x128xf32>
    %13 = tpu.concatenate %8, %12 in 1 : vector<24x128xf32>, vector<24x128xf32> -> vector<24x256xf32>
    %cst = arith.constant dense<0.000000e+00> : vector<8x256xf32>
    %14 = tpu.matmul %4, %13, %cst {dimension_numbers = #tpu.dot_dimension_numbers<[1], [0], [0], [1], [0, 0, 1, 1], [], []>} : vector<8x24xf32>, vector<24x256xf32>, vector<8x256xf32> -> vector<8x256xf32>
    %c0_6 = arith.constant 0 : index
    %c0_7 = arith.constant 0 : index
    %15 = vector.load %arg3[%c0_6, %c0_7] : memref<16x256xf32, #tpu.memory_space<vmem>>, vector<8x256xf32>
    tpu.vector_store %arg3[%c0_6, %c0_7], %14 {strides = array<i32>} : memref<16x256xf32, #tpu.memory_space<vmem>>, vector<8x256xf32>,
    %c0_8 = arith.constant 0 : index
    %c0_9 = arith.constant 0 : index
    %16 = vector.load %arg2[%c0_8, %c0_9] : memref<8x40xf32, #tpu.memory_space<vmem>>, vector<8x40xf32>
    %17 = vector.extract_strided_slice %1 {offsets = [0, 0], sizes = [8, 128], strides = [1, 1]} : vector<8x132xf32> to vector<8x128xf32>
    %18 = vector.extract_strided_slice %1 {offsets = [0, 1], sizes = [8, 128], strides = [1, 1]} : vector<8x132xf32> to vector<8x128xf32>
    %19 = vector.extract_strided_slice %1 {offsets = [0, 2], sizes = [8, 128], strides = [1, 1]} : vector<8x132xf32> to vector<8x128xf32>
    %20 = vector.extract_strided_slice %1 {offsets = [0, 3], sizes = [8, 128], strides = [1, 1]} : vector<8x132xf32> to vector<8x128xf32>
    %21 = vector.extract_strided_slice %1 {offsets = [0, 4], sizes = [8, 128], strides = [1, 1]} : vector<8x132xf32> to vector<8x128xf32>
    %22 = tpu.concatenate %17, %18, %19, %20, %21 in 0 : vector<8x128xf32>, vector<8x128xf32>, vector<8x128xf32>, vector<8x128xf32>, vector<8x128xf32> -> vector<40x128xf32>
    %23 = vector.extract_strided_slice %3 {offsets = [0, 0], sizes = [8, 128], strides = [1, 1]} : vector<8x132xf32> to vector<8x128xf32>
    %24 = vector.extract_strided_slice %3 {offsets = [0, 1], sizes = [8, 128], strides = [1, 1]} : vector<8x132xf32> to vector<8x128xf32>
    %25 = vector.extract_strided_slice %3 {offsets = [0, 2], sizes = [8, 128], strides = [1, 1]} : vector<8x132xf32> to vector<8x128xf32>
    %26 = vector.extract_strided_slice %3 {offsets = [0, 3], sizes = [8, 128], strides = [1, 1]} : vector<8x132xf32> to vector<8x128xf32>
    %27 = vector.extract_strided_slice %3 {offsets = [0, 4], sizes = [8, 128], strides = [1, 1]} : vector<8x132xf32> to vector<8x128xf32>
    %28 = tpu.concatenate %23, %24, %25, %26, %27 in 0 : vector<8x128xf32>, vector<8x128xf32>, vector<8x128xf32>, vector<8x128xf32>, vector<8x128xf32> -> vector<40x128xf32>
    %29 = tpu.concatenate %22, %28 in 1 : vector<40x128xf32>, vector<40x128xf32> -> vector<40x256xf32>
    %cst_10 = arith.constant dense<0.000000e+00> : vector<8x256xf32>
    %30 = tpu.matmul %16, %29, %cst_10 {dimension_numbers = #tpu.dot_dimension_numbers<[1], [0], [0], [1], [0, 0, 1, 1], [], []>} : vector<8x40xf32>, vector<40x256xf32>, vector<8x256xf32> -> vector<8x256xf32>
    %c8 = arith.constant 8 : index
    %c0_11 = arith.constant 0 : index
    %31 = vector.load %arg3[%c8, %c0_11] : memref<16x256xf32, #tpu.memory_space<vmem>>, vector<8x256xf32>
    tpu.vector_store %arg3[%c8, %c0_11], %30 {strides = array<i32>} : memref<16x256xf32, #tpu.memory_space<vmem>>, vector<8x256xf32>,
    return
  }
}

</mosaic_0001>

<bundles_post_ra>
// kernel: tpu_custom_call.1
= control target key start
LH: loop header
LB: loop body
LE: loop exit
PB: predicated region body
PF: predicated region fallthrough
CT: control target
= control target key end

     0   :  { %8 = vsyncpa [#allocation3], 0  ;;  %s491_s0 = inlined_call_operand.hbm [shape: f32[2,8,132], index: 0, kind: input, shape index: {}]   ;;  %s492_s1 = inlined_call_operand.hbm [shape: f32[8,24], index: 1, kind: input, shape index: {}]   ;;  %s493_s2 = inlined_call_operand.hbm [shape: f32[8,40], index: 2, kind: input, shape index: {}]   ;;  %s494_s3 = inlined_call_operand.hbm [shape: f32[16,256], index: 3, kind: output, shape index: {}]  }
   0x1   :  { %9 = vsyncpa [#allocation6], 0 }
   0x2   :  { %10 = vsyncpa [#allocation4], 0  ;;  %s410_s12 = smov [#allocation5]   ;;  %s411_s14 = smov [#allocation2]  }
   0x3   :  { %s29_s13 = sshll.u32 %s410_s12, 4  ;;  %s16_s15 = sshll.u32 %s411_s14, 4  ;;  %s30_s13 = int_to_ptr.vmem [resolvable:$true] %s29_s13  ;;  %s17_s15 = int_to_ptr.vmem [resolvable:$true] %s16_s15 }
   0x4   :  { %s332_s16 = scalar_lea.vmem %s30_s13, 128  ;;  %p337_p1 = scmp.lt.s32.totalorder %s30_s13, %s30_s13 }
   0x5   :  { %p333_p0 = scmp.ne.s32.totalorder %s30_s13, %s332_s16  ;;  %p338_p2 = scmp.lt.s32.totalorder %s332_s16, %s332_s16 }
   0x7   :  { %p339_p3 = por %p338_p2, %p337_p1 }
   0x9   :  { %p340_p4 = pnand %p339_p3, %p333_p0 }
   0xb   :  { %343 = shalt.err (!%p340_p4)
}
   0xc   :  { %32 = dma.hbm_to_vmem [thread:$0]  %s492_s1, 128, %s30_s13, [#allocation6]  }
   0xd   :  { %s352_s19 = scalar_lea.vmem %s17_s15, 512  ;;  %p357_p6 = scmp.lt.s32.totalorder %s17_s15, %s17_s15 }
   0xe   :  { %p353_p5 = scmp.ne.s32.totalorder %s17_s15, %s352_s19  ;;  %p358_p7 = scmp.lt.s32.totalorder %s352_s19, %s352_s19 }
  0x10   :  { %p359_p8 = por %p358_p7, %p357_p6 }
  0x12   :  { %p360_p9 = pnand %p359_p8, %p353_p5 }
  0x14   :  { %363 = shalt.err (!%p360_p9)
}
  0x15   :  { %s412_s20 = smov 256   ;;  %s413_s21 = smov 16  }
  0x16   :  { %22 = dma.hbm_to_vmem [thread:$0]  %s491_s0, 512, %s17_s15, [#allocation3], %s412_s20, %s412_s20, %s413_s21  }
  0x17   :  { %s414_s24 = smov [#allocation7]  }
  0x18   :  { %s39_s25 = sshll.u32 %s414_s24, 4  ;;  %s40_s25 = int_to_ptr.vmem [resolvable:$true] %s39_s25 }
  0x19   :  { %s372_s1 = scalar_lea.vmem %s40_s25, 128  ;;  %p377_p11 = scmp.lt.s32.totalorder %s40_s25, %s40_s25 }
  0x1a   :  { %p373_p10 = scmp.ne.s32.totalorder %s40_s25, %s372_s1  ;;  %p378_p12 = scmp.lt.s32.totalorder %s372_s1, %s372_s1 }
  0x1c   :  { %p379_p13 = por %p378_p12, %p377_p11 }
  0x1e   :  { %p380_p0 = pnand %p379_p13, %p373_p10 }
  0x20   :  { %383 = shalt.err (!%p380_p0)
}
  0x21   :  { %42 = dma.hbm_to_vmem [thread:$0]  %s493_s2, 128, %s40_s25, [#allocation6]  }
  0x22   :  { %404 = dma.done.wait [#allocation3], 512  }
  0x23   :  { %405 = vsyncadd [#allocation3], 4294966784 }
  0x24   :  { %406 = dma.done.wait [#allocation6], 256  }
  0x25   :  { %407 = vsyncadd [#allocation6], 4294967040  ;;  %v453_v0 = vld [vmem:[#allocation2 + $0x10] sm:$0xff]  ;;  %v455_v1 = vld [vmem:[#allocation2] sm:$0xff]  ;;  %s415_s0 = smov 126   ;;  %s416_s28 = smov 127  }
  0x26   :  { %79 = vrot.lane.b32.xlu0 %v453_v0, %s415_s0  ;;  %66 = vrot.lane.b32.xlu1 %v455_v1, %s415_s0  ;;  %v56_v2 = vld [vmem:[#allocation2 + $0x18] sm:$0xff]  ;;  %v53_v3 = vld [vmem:[#allocation2 + $0x8] sm:$0xff]  ;;  %s417_s2 = smov 124   ;;  %s418_s29 = smov 125   ;;  %vm70_vm0 = vcmask 1031168   ;;  %v419_v9 = vmov 0.0  }
  0x27   :  { %284 = vmatprep.mubr.f32.mxu1 %v419_v9  ;;  %178 = vmatprep.mubr.f32.mxu0 %v419_v9  ;;  %vm64_vm1 = vcmask 1039360   ;;  %vm200_vm2 = vcmask 1014784   ;;  %vm193_vm3 = vcmask 1022976   ;;  %v187_v29 = vld [vmem:[#allocation7] sm:$0xff]  ;;  %vm216_vm4 = vcmask 326656   ;;  %v57_v42 = vld [vmem:[#allocation5] sm:$0xff] }
  0x28   :  { %vm110_vm5 = vcmask 195584   ;;  %s420_s30 = smov [#allocation8]  }
  0x29   :  { %s298_s4 = sshll.u32 %s420_s30, 4  ;;  %s299_s4 = int_to_ptr.vmem [resolvable:$true] %s298_s4 }
  0x2a   :  { %81 = vrot.lane.b32.xlu0 %v56_v2, %s415_s0  ;;  %68 = vrot.lane.b32.xlu1 %v53_v3, %s415_s0  ;;  %s384_s5 = scalar_lea.vmem %s299_s4, 512  ;;  %p389_p2 = scmp.lt.s32.totalorder %s299_s4, %s299_s4 }
  0x2b   :  { %p385_p1 = scmp.ne.s32.totalorder %s299_s4, %s384_s5  ;;  %p390_p3 = scmp.lt.s32.totalorder %s384_s5, %s384_s5 }
  0x2d   :  { %p391_p4 = por %p390_p3, %p389_p2 }
  0x2e   :  { %74 = vrot.lane.b32.xlu0 %v453_v0, %s416_s28  ;;  %76 = vrot.lane.b32.xlu1 %v56_v2, %s416_s28 }
  0x2f   :  { %p392_p5 = pnand %p391_p4, %p385_p1 }
  0x32   :  { %60 = vrot.lane.b32.xlu0 %v455_v1, %s416_s28  ;;  %62 = vrot.lane.b32.xlu1 %v53_v3, %s416_s28 }
  0x36   :  { %210 = vrot.lane.b32.xlu0 %v453_v0, %s417_s2  ;;  %212 = vrot.lane.b32.xlu1 %v56_v2, %s417_s2 }
  0x3a   :  { %196 = vrot.lane.b32.xlu0 %v455_v1, %s417_s2  ;;  %198 = vrot.lane.b32.xlu1 %v53_v3, %s417_s2 }
  0x3e   :  { %204 = vrot.lane.b32.xlu0 %v453_v0, %s418_s29  ;;  %206 = vrot.lane.b32.xlu1 %v56_v2, %s418_s29 }
  0x42   :  { %189 = vrot.lane.b32.xlu0 %v455_v1, %s418_s29  ;;  %191 = vrot.lane.b32.xlu1 %v53_v3, %s418_s29 }
  0x98   :  { %v80_v4 = vpop.permute.xlu0 %79  ;;  %v67_v5 = vpop.permute.xlu1 %66 }
  0x9c   :  { %v82_v6 = vpop.permute.xlu0 %81  ;;  %v69_v7 = vpop.permute.xlu1 %68 }
  0x9d   :  { %103 = vrot.lane.b32.xlu1 %v82_v6, %s416_s28  ;;  %v83_v8 = vsel %vm70_vm0, %v80_v4, %v82_v6  ;;  %v71_v12 = vsel %vm70_vm0, %v67_v5, %v69_v7 }
  0x9e   :  { %101 = vrot.lane.b32.xlu0 %v83_v8, %s416_s28 }
  0xa0   :  { %v75_v10 = vpop.permute.xlu0 %74  ;;  %v77_v11 = vpop.permute.xlu1 %76 }
  0xa1   :  { %90 = vrot.lane.b32.xlu1 %v69_v7, %s416_s28  ;;  %v78_v13 = vsel %vm64_vm1, %v75_v10, %v77_v11 }
  0xa2   :  { %88 = vrot.lane.b32.xlu0 %v71_v12, %s416_s28 }
  0xa4   :  { %v61_v14 = vpop.permute.xlu0 %60  ;;  %v63_v15 = vpop.permute.xlu1 %62 }
  0xa5   :  { %99 = vrot.lane.b32.xlu1 %v77_v11, %s416_s28  ;;  %v65_v16 = vsel %vm64_vm1, %v61_v14, %v63_v15 }
  0xa6   :  { %97 = vrot.lane.b32.xlu0 %v78_v13, %s416_s28 }
  0xa8   :  { %v211_v17 = vpop.permute.xlu0 %210  ;;  %v213_v18 = vpop.permute.xlu1 %212 }
  0xa9   :  { %86 = vrot.lane.b32.xlu1 %v63_v15, %s416_s28  ;;  %v214_v19 = vsel %vm200_vm2, %v211_v17, %v213_v18 }
  0xaa   :  { %84 = vrot.lane.b32.xlu0 %v65_v16, %s416_s28  ;;  %242 = vmatprep.subr.mxu1 %v214_v19 }
  0xac   :  { %v197_v20 = vpop.permute.xlu0 %196  ;;  %v199_v21 = vpop.permute.xlu1 %198 }
  0xad   :  { %v201_v22 = vsel %vm200_vm2, %v197_v20, %v199_v21 }
  0xae   :  { %243 = vmatpush1.msra.mxu1 %v201_v22 }
  0xb0   :  { %v205_v23 = vpop.permute.xlu0 %204  ;;  %v207_v24 = vpop.permute.xlu1 %206 }
  0xb1   :  { %v208_v25 = vsel %vm193_vm3, %v205_v23, %v207_v24 }
  0xb2   :  { %244 = vmatprep.subr.mxu1 %v208_v25 }
  0xb4   :  { %v190_v26 = vpop.permute.xlu0 %189  ;;  %v192_v27 = vpop.permute.xlu1 %191 }
  0xb5   :  { %v194_v28 = vsel %vm193_vm3, %v190_v26, %v192_v27 }
  0xb6   :  { %245 = vmatpush1.msra.mxu1 %v194_v28 }
  0xb7   :  { %246 = vmatprep.subr.mxu1 %v83_v8 }
  0xb8   :  { %247 = vmatpush1.msra.mxu1 %v71_v12 }
  0xb9   :  { %248 = vmatprep.subr.mxu1 %v78_v13 }
  0xba   :  { %249 = vmatpush1.msra.mxu1 %v65_v16 }
  0xbb   :  { %250 = vmatprep.subr.mxu1 %v453_v0 }
  0xbc   :  { %251 = vmatpush1.msra.mxu1 %v455_v1 }
  0xbd   :  { %312 = vmatmul.mubr.msk.f32.vlgmr.msra.gmra.mxu1 %vm216_vm4, %v187_v29 }
 0x10f   :  { %v104_v30 = vpop.permute.xlu1 %103 }
 0x110   :  { %v102_v31 = vpop.permute.xlu0 %101 }
 0x111   :  { %v106_v32 = vsel %vm64_vm1, %v102_v31, %v104_v30 }
 0x112   :  { %140 = vmatprep.subr.mxu0 %v106_v32 }
 0x113   :  { %v91_v33 = vpop.permute.xlu1 %90 }
 0x114   :  { %v89_v34 = vpop.permute.xlu0 %88 }
 0x115   :  { %v93_v35 = vsel %vm64_vm1, %v89_v34, %v91_v33 }
 0x116   :  { %141 = vmatpush1.msra.mxu0 %v93_v35 }
 0x117   :  { %v100_v36 = vpop.permute.xlu1 %99 }
 0x118   :  { %v98_v37 = vpop.permute.xlu0 %97 }
 0x119   :  { %v105_v38 = vsel %vm64_vm1, %v98_v37, %v100_v36 }
 0x11a   :  { %142 = vmatprep.subr.mxu0 %v105_v38 }
 0x11b   :  { %v87_v39 = vpop.permute.xlu1 %86 }
 0x11c   :  { %v85_v40 = vpop.permute.xlu0 %84 }
 0x11d   :  { %v92_v41 = vsel %vm64_vm1, %v85_v40, %v87_v39 }
 0x11e   :  { %143 = vmatpush1.msra.mxu0 %v92_v41 }
 0x11f   :  { %144 = vmatprep.subr.mxu0 %v78_v13 }
 0x120   :  { %145 = vmatpush1.msra.mxu0 %v65_v16 }
 0x121   :  { %311 = vmatmul.mubr.msk.f32.vlgmr.msra.gmra.mxu0 %vm110_vm5, %v57_v42 }
 0x17d   :  { %v286_v43 = vpop.f32.mrf.mxu1 }
 0x17e   :  { %291 = vst [vmem:[#allocation8 + $0x10] sm:$0xff] %v286_v43 }
 0x17f   :  { %v288_v44 = vpop.f32.mrf.mxu1 }
 0x180   :  { %292 = vst [vmem:[#allocation8 + $0x18] sm:$0xff] %v288_v44 }
 0x1e1   :  { %v180_v45 = vpop.f32.mrf.mxu0 }
 0x1e2   :  { %185 = vst [vmem:[#allocation8] sm:$0xff] %v180_v45 }
 0x1e3   :  { %v182_v46 = vpop.f32.mrf.mxu0 }
 0x1e4   :  { %186 = vst [vmem:[#allocation8 + $0x8] sm:$0xff] %v182_v46 }
 0x1e5   :  { %395 = shalt.err (!%p392_p5)
}
 0x1e6   :  { %304 = dma.vmem_to_hbm [thread:$0]  %s299_s4, 512, %s494_s3, [#allocation4], %s412_s20, %s412_s20, %s413_s21  }
 0x1e7   :  { %408 = dma.done.wait [#allocation4], 512  }
 0x1e8   :  { %409 = vsyncadd [#allocation4], 4294966784 }
 0x1e9   :  { %308 = vsyncpa [#allocation3], 1 }
 0x1ea   :  { %309 = vsyncpa [#allocation6], 1 }
 0x1eb   :  { %310 = vsyncpa [#allocation4], 1 }

</bundles_post_ra>
